<compile_context>
chip_gen: v7x
topology: tpu7x:2x2x1
jax: 0.10.0
libtpu: 0.0.40
codegen_flags: <defaults>
</compile_context>

<pallas_src>
import functools

import jax
import jax.numpy as jnp
from jax import lax
from jax.experimental import pallas as pl
from jax.experimental.pallas import tpu as pltpu


# ----------------------------------------------------------------------------
# Fused Pallas kernel: one grid step == one MPN step
# ----------------------------------------------------------------------------
def _mpn_fused_kernel(
    x0_ref, e_ref, sel_ref,                       # graph inputs (step-constant)
    w_sm_ref, w_d_ref, w_e_ref, b_e_ref,          # edge model (per step)
    wm_e_ref, b_m_ref, wn_x_ref, wn_a_ref, b_n_ref,  # node model (per step)
    e_out_ref, x_out_ref,                         # outputs
    x_scr,                                        # VMEM carry for x
):
    s = pl.program_id(0)
    last = pl.num_programs(0) - 1
    m = e_ref.shape[0]            # number of edges
    de_pad = e_ref.shape[1]       # lane-dense (multiple of 128) edge dim
    f32 = jnp.float32
    cdt = sel_ref.dtype           # matmul operand dtype (f32 here, bf16 option)

    # Initialize the node-feature carry once; it stays resident in VMEM.
    @pl.when(s == 0)
    def _init():
        x_scr[...] = x0_ref[...].astype(x_scr.dtype)

    x = x_scr[...]                                    # [N, Dn] f32 carry
    xc = x.astype(cdt)
    e = e_ref[...]                                    # [M, de_pad]
    sel = sel_ref[...]                                # [2M, N]: rows :M = one_hot(src), M: = one_hot(dst)

    # Fused endpoint gather: one MXU contraction selects x[src] and x[dst].
    xsd = jnp.dot(sel, xc, preferred_element_type=f32)       # [2M, Dn]
    x_src = xsd[:m].astype(cdt)                               # exact copies of x rows
    x_dst = xsd[m:].astype(cdt)

    # Fused projection of x[src] for the edge model (cols :de_pad) and the
    # message model (cols de_pad:) — x[src] goes through the MXU once.
    p_src = jnp.dot(x_src, w_sm_ref[...], preferred_element_type=f32)  # [M, de_pad+Dm]

    # ---- edge model: relu(x_src Ws + x_dst Wd + e We + be) ----
    e_new = jnp.maximum(
        p_src[:, :de_pad]
        + jnp.dot(x_dst, w_d_ref[...], preferred_element_type=f32)
        + jnp.dot(e, w_e_ref[...], preferred_element_type=f32)
        + b_e_ref[...],
        0.0)                                                   # [M, de_pad] f32
    e_out_ref[...] = e_new.astype(e_out_ref.dtype)

    # ---- node model (skipped on the last step, matching the reference) ----
    @pl.when(s < last)
    def _node_update():
        msg = jnp.maximum(
            p_src[:, de_pad:]
            + jnp.dot(e_new.astype(cdt), wm_e_ref[...], preferred_element_type=f32)
            + b_m_ref[...],
            0.0)                                               # [M, Dm]
        # segment_sum(msg, dst) == S_dst^T @ msg; the MXU handles the
        # LHS-transposed contraction directly (no explicit transpose input).
        agg = lax.dot_general(
            sel[m:], msg.astype(cdt),
            dimension_numbers=(((0,), (0,)), ((), ())),
            preferred_element_type=f32)                        # [N, Dm]
        x_new = jnp.maximum(
            jnp.dot(xc, wn_x_ref[...], preferred_element_type=f32)
            + jnp.dot(agg.astype(cdt), wn_a_ref[...], preferred_element_type=f32)
            + b_n_ref[...],
            0.0)                                               # [N, Dn]
        x_scr[...] = x_new

    @pl.when(s == last)
    def _finalize():
        x_out_ref[...] = x_scr[...].astype(x_out_ref.dtype)


# ----------------------------------------------------------------------------
# Parameter stacking / padding (host-side prep, done once under jit)
# ----------------------------------------------------------------------------
def _stack_and_pad_params(params, steps, dn, de, dm, de_pad, mm_dtype):
    """Stack per-step weights along a leading step axis.

    * Edge-output dim padded de -> de_pad with zeros (exact: padded outputs
      are relu(0)=0 and the matching padded rows of Wme multiply those zeros).
    * Ws and Wms concatenated along the output dim ([dn, de_pad + dm]).
    * Node-model slots for the last step are zero-filled (never used; the
      node update is gated by pl.when(s < last)).
    """
    def pad_last(w, n):
        return jnp.pad(w, ((0, 0), (0, n - w.shape[-1])))

    def pad_first(w, n):
        return jnp.pad(w, ((0, n - w.shape[0]), (0, 0)))

    w_sm, w_d, w_e, b_e = [], [], [], []
    wm_e, b_m, wn_x, wn_a, b_n = [], [], [], [], []
    for s in range(steps):
        ep = params["edge"][s]
        w_d.append(pad_last(ep["w_d"], de_pad))
        w_e.append(pad_last(pad_first(ep["w_e"], de_pad), de_pad))
        b_e.append(pad_last(ep["b"], de_pad))
        if s < steps - 1:
            npar = params["node"][s]
            wm_s = npar["wm_s"]
            wm_e.append(pad_first(npar["wm_e"], de_pad))
            b_m.append(npar["bm"])
            wn_x.append(npar["wn_x"])
            wn_a.append(npar["wn_a"])
            b_n.append(npar["bn"])
        else:
            wm_s = jnp.zeros((dn, dm), jnp.float32)
            wm_e.append(jnp.zeros((de_pad, dm), jnp.float32))
            b_m.append(jnp.zeros((1, dm), jnp.float32))
            wn_x.append(jnp.zeros((dn, dn), jnp.float32))
            wn_a.append(jnp.zeros((dm, dn), jnp.float32))
            b_n.append(jnp.zeros((1, dn), jnp.float32))
        w_sm.append(jnp.concatenate([pad_last(ep["w_s"], de_pad), wm_s], axis=1))

    st = lambda lst, dt: jnp.stack(lst).astype(dt)
    return dict(
        w_sm=st(w_sm, mm_dtype), w_d=st(w_d, mm_dtype), w_e=st(w_e, mm_dtype),
        b_e=st(b_e, jnp.float32),
        wm_e=st(wm_e, mm_dtype), b_m=st(b_m, jnp.float32),
        wn_x=st(wn_x, mm_dtype), wn_a=st(wn_a, mm_dtype), b_n=st(b_n, jnp.float32),
    )


# ----------------------------------------------------------------------------
# pallas_call wrapper
# ----------------------------------------------------------------------------
@functools.partial(jax.jit, static_argnames=("steps", "matmul_dtype"))
def mpn_forward(x, edge_index, edge_attr, params, *, steps, matmul_dtype=jnp.float32):
    """Pallas implementation of MessagePassingNetworkNonRecurrent.forward."""
    n, dn = x.shape
    m, de = edge_attr.shape
    dm = params["node"][0]["wm_e"].shape[1] if steps > 1 else dn
    de_pad = ((de + 127) // 128) * 128    # lane-dense edge-embedding stores

    # Dense one-hot selectors; gather + segment-sum become MXU contractions.
    sel = jnp.concatenate(
        [jax.nn.one_hot(edge_index[0], n, dtype=matmul_dtype),
         jax.nn.one_hot(edge_index[1], n, dtype=matmul_dtype)], axis=0)   # [2M, N]
    e_pad = jnp.pad(edge_attr, ((0, 0), (0, de_pad - de))).astype(matmul_dtype)
    sp = _stack_and_pad_params(params, steps, dn, de, dm, de_pad, matmul_dtype)

    def const2(shape):        # step-constant input: resident across the grid
        return pl.BlockSpec(shape, lambda s: (0, 0))

    def per_step(d1, d2):     # per-step weight slice, pipelined over the grid
        return pl.BlockSpec((None, d1, d2), lambda s: (s, 0, 0))

    grid_spec = pltpu.PrefetchScalarGridSpec(
        num_scalar_prefetch=0,
        grid=(steps,),
        in_specs=[
            const2((n, dn)),               # x0
            const2((m, de_pad)),           # edge_attr (padded, constant)
            const2((2 * m, n)),            # stacked one-hot selectors
            per_step(dn, de_pad + dm),     # [Ws | Wms]
            per_step(dn, de_pad),          # Wd
            per_step(de_pad, de_pad),      # We
            per_step(1, de_pad),           # be
            per_step(de_pad, dm),          # Wme
            per_step(1, dm),               # bm
            per_step(dn, dn),              # Wnx
            per_step(dm, dn),              # Wna
            per_step(1, dn),               # bn
        ],
        out_specs=(
            pl.BlockSpec((None, m, de_pad), lambda s: (s, 0, 0)),  # per-step edge emb
            pl.BlockSpec((n, dn), lambda s: (0, 0)),               # final x
        ),
        scratch_shapes=[pltpu.VMEM((n, dn), jnp.float32)],          # x carry
    )

    e_all, x_out = pl.pallas_call(
        _mpn_fused_kernel,
        out_shape=(jax.ShapeDtypeStruct((steps, m, de_pad), jnp.float32),
                   jax.ShapeDtypeStruct((n, dn), jnp.float32)),
        grid_spec=grid_spec,
        compiler_params=pltpu.CompilerParams(
            dimension_semantics=("arbitrary",),   # step axis carries x -> sequential
            vmem_limit_bytes=8 * 1024 * 1024),
    )(x, e_pad, sel,
      sp["w_sm"], sp["w_d"], sp["w_e"], sp["b_e"],
      sp["wm_e"], sp["b_m"], sp["wn_x"], sp["wn_a"], sp["b_n"])

    edge_embeddings = [e_all[s, :, :de] for s in range(steps)]
    return x_out, edge_embeddings


# ----------------------------------------------------------------------------
# Pure-JAX reference (for correctness check)
# ----------------------------------------------------------------------------
def mpn_forward_ref(x, edge_index, edge_attr, params, steps):
    src, dst = edge_index[0], edge_index[1]
    n = x.shape[0]
    edge_embeddings = []
    for step in range(steps):
        ep = params["edge"][step]
        x_src = x[src]
        x_dst = x[dst]
        e_new = jax.nn.relu(x_src @ ep["w_s"] + x_dst @ ep["w_d"]
                            + edge_attr @ ep["w_e"] + ep["b"])
        edge_embeddings.append(e_new)
        if step == steps - 1:
            continue
        npar = params["node"][step]
        msg = jax.nn.relu(x_src @ npar["wm_s"] + e_new @ npar["wm_e"] + npar["bm"])
        agg = jax.ops.segment_sum(msg, dst, num_segments=n)
        x = jax.nn.relu(x @ npar["wn_x"] + agg @ npar["wn_a"] + npar["bn"])
    return x, edge_embeddings


# ----------------------------------------------------------------------------
# Deterministic parameter init
# ----------------------------------------------------------------------------
def init_params(key, steps, dn, de, dm):
    def dense(k, fan_in, shape):
        return jax.random.normal(k, shape, jnp.float32) / jnp.sqrt(fan_in)

    edge_params, node_params = [], []
    for s in range(steps):
        k = jax.random.fold_in(key, 100 + s)
        ks = jax.random.split(k, 4)
        edge_params.append(dict(
            w_s=dense(ks[0], dn, (dn, de)),
            w_d=dense(ks[1], dn, (dn, de)),
            w_e=dense(ks[2], de, (de, de)),
            b=0.01 * jax.random.normal(ks[3], (1, de), jnp.float32),
        ))
    for s in range(steps - 1):
        k = jax.random.fold_in(key, 200 + s)
        ks = jax.random.split(k, 6)
        node_params.append(dict(
            wm_s=dense(ks[0], dn, (dn, dm)),
            wm_e=dense(ks[1], de, (de, dm)),
            bm=0.01 * jax.random.normal(ks[2], (1, dm), jnp.float32),
            wn_x=dense(ks[3], dn, (dn, dn)),
            wn_a=dense(ks[4], dm, (dm, dn)),
            bn=0.01 * jax.random.normal(ks[5], (1, dn), jnp.float32),
        ))
    return dict(edge=edge_params, node=node_params)


# ----------------------------------------------------------------------------
if __name__ == "__main__":
    STEPS = 3          # 3 edge models, 2 node models
    N, M = 8, 16       # nodes, edges
    DN, DE, DM = 32, 32, 32

    key = jax.random.PRNGKey(0)
    kx, ke, ki, kj, kp = jax.random.split(key, 5)

    x = jax.random.normal(kx, (N, DN), jnp.float32)
    edge_attr = jax.random.normal(ke, (M, DE), jnp.float32)
    edge_index = jnp.stack([
        jax.random.randint(ki, (M,), 0, N, dtype=jnp.int32),
        jax.random.randint(kj, (M,), 0, N, dtype=jnp.int32),
    ], axis=0)  # [2, M]

    params = init_params(kp, STEPS, DN, DE, DM)

    x_out, edge_embs = mpn_forward(x, edge_index, edge_attr, params, steps=STEPS)
    x_out = jax.block_until_ready(x_out)
    edge_embs = [jax.block_until_ready(e) for e in edge_embs]

    x_ref, edge_embs_ref = mpn_forward_ref(x, edge_index, edge_attr, params, STEPS)

    assert len(edge_embs) == STEPS
    assert x_out.shape == (N, DN)
    assert jnp.allclose(x_out, x_ref, rtol=2e-2, atol=2e-2), \
        float(jnp.max(jnp.abs(x_out - x_ref)))
    for a, b in zip(edge_embs, edge_embs_ref):
        assert a.shape == (M, DE)
        assert jnp.allclose(a, b, rtol=2e-2, atol=2e-2), \
            float(jnp.max(jnp.abs(a - b)))

    print("KERNEL_OK")
</pallas_src>

<mosaic_0001>
module attributes {stable_mosaic.version = 11 : i64} {
  func.func @_mpn_fused_kernel(%arg0: i32, %arg1: memref<8x32xf32, #tpu.memory_space<vmem>>, %arg2: memref<16x128xf32, #tpu.memory_space<vmem>>, %arg3: memref<32x8xf32, #tpu.memory_space<vmem>>, %arg4: memref<1x32x160xf32, #tpu.memory_space<vmem>>, %arg5: memref<1x32x128xf32, #tpu.memory_space<vmem>>, %arg6: memref<1x128x128xf32, #tpu.memory_space<vmem>>, %arg7: memref<1x1x128xf32, #tpu.memory_space<vmem>>, %arg8: memref<1x128x32xf32, #tpu.memory_space<vmem>>, %arg9: memref<1x1x32xf32, #tpu.memory_space<vmem>>, %arg10: memref<1x32x32xf32, #tpu.memory_space<vmem>>, %arg11: memref<1x32x32xf32, #tpu.memory_space<vmem>>, %arg12: memref<1x1x32xf32, #tpu.memory_space<vmem>>, %arg13: memref<1x16x128xf32, #tpu.memory_space<vmem>>, %arg14: memref<8x32xf32, #tpu.memory_space<vmem>>, %arg15: memref<8x32xf32, #tpu.memory_space<vmem>>) attributes {dimension_semantics = [#tpu.dimension_semantics<arbitrary>], iteration_bounds = array<i64: 3>, scalar_prefetch = 0 : i64, scratch_operands = 1 : i64, tpu.core_type = #tpu.core_type<tc>, window_params = [{pipeline_mode = #tpu.pipeline_mode<synchronous>, transform_indices = @transform_0, window_bounds = array<i64: 8, 32>}, {pipeline_mode = #tpu.pipeline_mode<synchronous>, transform_indices = @transform_1, window_bounds = array<i64: 16, 128>}, {pipeline_mode = #tpu.pipeline_mode<synchronous>, transform_indices = @transform_2, window_bounds = array<i64: 32, 8>}, {transform_indices = @transform_3, window_bounds = array<i64: 1, 32, 160>}, {transform_indices = @transform_4, window_bounds = array<i64: 1, 32, 128>}, {transform_indices = @transform_5, window_bounds = array<i64: 1, 128, 128>}, {transform_indices = @transform_6, window_bounds = array<i64: 1, 1, 128>}, {transform_indices = @transform_7, window_bounds = array<i64: 1, 128, 32>}, {transform_indices = @transform_8, window_bounds = array<i64: 1, 1, 32>}, {transform_indices = @transform_9, window_bounds = array<i64: 1, 32, 32>}, {transform_indices = @transform_10, window_bounds = array<i64: 1, 32, 32>}, {transform_indices = @transform_11, window_bounds = array<i64: 1, 1, 32>}, {transform_indices = @transform_12, window_bounds = array<i64: 1, 16, 128>}, {pipeline_mode = #tpu.pipeline_mode<synchronous>, transform_indices = @transform_13, window_bounds = array<i64: 8, 32>}]} {
    %c0_i32 = arith.constant 0 : i32
    %0 = arith.cmpi eq, %arg0, %c0_i32 : i32
    %1 = arith.extui %0 : i1 to i32
    %c0_i32_0 = arith.constant 0 : i32
    %2 = arith.cmpi ne, %1, %c0_i32_0 : i32
    scf.if %2 {
      %c0_28 = arith.constant 0 : index
      %c0_29 = arith.constant 0 : index
      %36 = vector.load %arg1[%c0_28, %c0_29] : memref<8x32xf32, #tpu.memory_space<vmem>>, vector<8x32xf32>
      %c0_30 = arith.constant 0 : index
      %c0_31 = arith.constant 0 : index
      %37 = vector.load %arg15[%c0_30, %c0_31] : memref<8x32xf32, #tpu.memory_space<vmem>>, vector<8x32xf32>
      tpu.vector_store %arg15[%c0_30, %c0_31], %36 {strides = array<i32>} : memref<8x32xf32, #tpu.memory_space<vmem>>, vector<8x32xf32>,
    } else {
    }
    %c0 = arith.constant 0 : index
    %c0_1 = arith.constant 0 : index
    %3 = vector.load %arg15[%c0, %c0_1] : memref<8x32xf32, #tpu.memory_space<vmem>>, vector<8x32xf32>
    %c0_2 = arith.constant 0 : index
    %c0_3 = arith.constant 0 : index
    %4 = vector.load %arg2[%c0_2, %c0_3] : memref<16x128xf32, #tpu.memory_space<vmem>>, vector<16x128xf32>
    %c0_4 = arith.constant 0 : index
    %c0_5 = arith.constant 0 : index
    %5 = vector.load %arg3[%c0_4, %c0_5] : memref<32x8xf32, #tpu.memory_space<vmem>>, vector<32x8xf32>
    %cst = arith.constant dense<0.000000e+00> : vector<32x32xf32>
    %6 = tpu.matmul %5, %3, %cst {dimension_numbers = #tpu.dot_dimension_numbers<[1], [0], [0], [1], [0, 0, 1, 1], [], []>} : vector<32x8xf32>, vector<8x32xf32>, vector<32x32xf32> -> vector<32x32xf32>
    %7 = vector.extract_strided_slice %6 {offsets = [0, 0], sizes = [16, 32], strides = [1, 1]} : vector<32x32xf32> to vector<16x32xf32>
    %8 = vector.extract_strided_slice %6 {offsets = [16, 0], sizes = [16, 32], strides = [1, 1]} : vector<32x32xf32> to vector<16x32xf32>
    %c0_6 = arith.constant 0 : index
    %c0_7 = arith.constant 0 : index
    %c0_8 = arith.constant 0 : index
    %9 = vector.load %arg4[%c0_6, %c0_7, %c0_8] : memref<1x32x160xf32, #tpu.memory_space<vmem>>, vector<1x32x160xf32>
    %10 = vector.shape_cast %9 : vector<1x32x160xf32> to vector<32x160xf32>
    %cst_9 = arith.constant dense<0.000000e+00> : vector<16x160xf32>
    %11 = tpu.matmul %7, %10, %cst_9 {dimension_numbers = #tpu.dot_dimension_numbers<[1], [0], [0], [1], [0, 0, 1, 1], [], []>} : vector<16x32xf32>, vector<32x160xf32>, vector<16x160xf32> -> vector<16x160xf32>
    %12 = vector.extract_strided_slice %11 {offsets = [0, 0], sizes = [16, 128], strides = [1, 1]} : vector<16x160xf32> to vector<16x128xf32>
    %c0_10 = arith.constant 0 : index
    %c0_11 = arith.constant 0 : index
    %c0_12 = arith.constant 0 : index
    %13 = vector.load %arg5[%c0_10, %c0_11, %c0_12] : memref<1x32x128xf32, #tpu.memory_space<vmem>>, vector<1x32x128xf32>
    %14 = vector.shape_cast %13 : vector<1x32x128xf32> to vector<32x128xf32>
    %cst_13 = arith.constant dense<0.000000e+00> : vector<16x128xf32>
    %15 = tpu.matmul %8, %14, %cst_13 {dimension_numbers = #tpu.dot_dimension_numbers<[1], [0], [0], [1], [0, 0, 1, 1], [], []>} : vector<16x32xf32>, vector<32x128xf32>, vector<16x128xf32> -> vector<16x128xf32>
    %16 = arith.addf %12, %15 : vector<16x128xf32>
    %c0_14 = arith.constant 0 : index
    %c0_15 = arith.constant 0 : index
    %c0_16 = arith.constant 0 : index
    %17 = vector.load %arg6[%c0_14, %c0_15, %c0_16] : memref<1x128x128xf32, #tpu.memory_space<vmem>>, vector<1x128x128xf32>
    %18 = vector.shape_cast %17 : vector<1x128x128xf32> to vector<128x128xf32>
    %cst_17 = arith.constant dense<0.000000e+00> : vector<16x128xf32>
    %19 = tpu.matmul %4, %18, %cst_17 {dimension_numbers = #tpu.dot_dimension_numbers<[1], [0], [0], [1], [0, 0, 1, 1], [], []>} : vector<16x128xf32>, vector<128x128xf32>, vector<16x128xf32> -> vector<16x128xf32>
    %20 = arith.addf %16, %19 : vector<16x128xf32>
    %c0_18 = arith.constant 0 : index
    %c0_19 = arith.constant 0 : index
    %c0_20 = arith.constant 0 : index
    %21 = vector.load %arg7[%c0_18, %c0_19, %c0_20] : memref<1x1x128xf32, #tpu.memory_space<vmem>>, vector<1x1x128xf32>
    %22 = vector.shape_cast %21 : vector<1x1x128xf32> to vector<1x128xf32>
    %23 = vector.broadcast %22 : vector<1x128xf32> to vector<16x128xf32>
    %24 = arith.addf %20, %23 : vector<16x128xf32>
    %cst_21 = arith.constant 0.000000e+00 : f32
    %25 = vector.broadcast %cst_21 : f32 to vector<16x128xf32>
    %26 = arith.maximumf %24, %25 : vector<16x128xf32>
    %c0_22 = arith.constant 0 : index
    %c0_23 = arith.constant 0 : index
    %c0_24 = arith.constant 0 : index
    %27 = vector.load %arg13[%c0_22, %c0_23, %c0_24] : memref<1x16x128xf32, #tpu.memory_space<vmem>>, vector<1x16x128xf32>
    %28 = vector.shape_cast %27 : vector<1x16x128xf32> to vector<16x128xf32>
    %29 = vector.shape_cast %26 : vector<16x128xf32> to vector<1x16x128xf32>
    tpu.vector_store %arg13[%c0_22, %c0_23, %c0_24], %29 {strides = array<i32>} : memref<1x16x128xf32, #tpu.memory_space<vmem>>, vector<1x16x128xf32>,
    %c2_i32 = arith.constant 2 : i32
    %30 = arith.cmpi slt, %arg0, %c2_i32 : i32
    %31 = arith.extui %30 : i1 to i32
    %c0_i32_25 = arith.constant 0 : i32
    %32 = arith.cmpi ne, %31, %c0_i32_25 : i32
    scf.if %32 {
      %36 = vector.extract_strided_slice %11 {offsets = [0, 128], sizes = [16, 32], strides = [1, 1]} : vector<16x160xf32> to vector<16x32xf32>
      %c0_28 = arith.constant 0 : index
      %c0_29 = arith.constant 0 : index
      %c0_30 = arith.constant 0 : index
      %37 = vector.load %arg8[%c0_28, %c0_29, %c0_30] : memref<1x128x32xf32, #tpu.memory_space<vmem>>, vector<1x128x32xf32>
      %38 = vector.shape_cast %37 : vector<1x128x32xf32> to vector<128x32xf32>
      %cst_31 = arith.constant dense<0.000000e+00> : vector<16x32xf32>
      %39 = tpu.matmul %26, %38, %cst_31 {dimension_numbers = #tpu.dot_dimension_numbers<[1], [0], [0], [1], [0, 0, 1, 1], [], []>} : vector<16x128xf32>, vector<128x32xf32>, vector<16x32xf32> -> vector<16x32xf32>
      %40 = arith.addf %36, %39 : vector<16x32xf32>
      %c0_32 = arith.constant 0 : index
      %c0_33 = arith.constant 0 : index
      %c0_34 = arith.constant 0 : index
      %41 = vector.load %arg9[%c0_32, %c0_33, %c0_34] : memref<1x1x32xf32, #tpu.memory_space<vmem>>, vector<1x1x32xf32>
      %42 = vector.shape_cast %41 : vector<1x1x32xf32> to vector<1x32xf32>
      %43 = vector.broadcast %42 : vector<1x32xf32> to vector<16x32xf32>
      %44 = arith.addf %40, %43 : vector<16x32xf32>
      %cst_35 = arith.constant 0.000000e+00 : f32
      %45 = vector.broadcast %cst_35 : f32 to vector<16x32xf32>
      %46 = arith.maximumf %44, %45 : vector<16x32xf32>
      %47 = vector.extract_strided_slice %5 {offsets = [16, 0], sizes = [16, 8], strides = [1, 1]} : vector<32x8xf32> to vector<16x8xf32>
      %cst_36 = arith.constant dense<0.000000e+00> : vector<8x32xf32>
      %48 = tpu.matmul %47, %46, %cst_36 {dimension_numbers = #tpu.dot_dimension_numbers<[0], [0], [1], [1], [0, 1, 1, 1], [], []>} : vector<16x8xf32>, vector<16x32xf32>, vector<8x32xf32> -> vector<8x32xf32>
      %c0_37 = arith.constant 0 : index
      %c0_38 = arith.constant 0 : index
      %c0_39 = arith.constant 0 : index
      %49 = vector.load %arg10[%c0_37, %c0_38, %c0_39] : memref<1x32x32xf32, #tpu.memory_space<vmem>>, vector<1x32x32xf32>
      %50 = vector.shape_cast %49 : vector<1x32x32xf32> to vector<32x32xf32>
      %cst_40 = arith.constant dense<0.000000e+00> : vector<8x32xf32>
      %51 = tpu.matmul %3, %50, %cst_40 {dimension_numbers = #tpu.dot_dimension_numbers<[1], [0], [0], [1], [0, 0, 1, 1], [], []>} : vector<8x32xf32>, vector<32x32xf32>, vector<8x32xf32> -> vector<8x32xf32>
      %c0_41 = arith.constant 0 : index
      %c0_42 = arith.constant 0 : index
      %c0_43 = arith.constant 0 : index
      %52 = vector.load %arg11[%c0_41, %c0_42, %c0_43] : memref<1x32x32xf32, #tpu.memory_space<vmem>>, vector<1x32x32xf32>
      %53 = vector.shape_cast %52 : vector<1x32x32xf32> to vector<32x32xf32>
      %cst_44 = arith.constant dense<0.000000e+00> : vector<8x32xf32>
      %54 = tpu.matmul %48, %53, %cst_44 {dimension_numbers = #tpu.dot_dimension_numbers<[1], [0], [0], [1], [0, 0, 1, 1], [], []>} : vector<8x32xf32>, vector<32x32xf32>, vector<8x32xf32> -> vector<8x32xf32>
      %55 = arith.addf %51, %54 : vector<8x32xf32>
      %c0_45 = arith.constant 0 : index
      %c0_46 = arith.constant 0 : index
      %c0_47 = arith.constant 0 : index
      %56 = vector.load %arg12[%c0_45, %c0_46, %c0_47] : memref<1x1x32xf32, #tpu.memory_space<vmem>>, vector<1x1x32xf32>
      %57 = vector.shape_cast %56 : vector<1x1x32xf32> to vector<1x32xf32>
      %58 = vector.broadcast %57 : vector<1x32xf32> to vector<8x32xf32>
      %59 = arith.addf %55, %58 : vector<8x32xf32>
      %cst_48 = arith.constant 0.000000e+00 : f32
      %60 = vector.broadcast %cst_48 : f32 to vector<8x32xf32>
      %61 = arith.maximumf %59, %60 : vector<8x32xf32>
      %c0_49 = arith.constant 0 : index
      %c0_50 = arith.constant 0 : index
      %62 = vector.load %arg15[%c0_49, %c0_50] : memref<8x32xf32, #tpu.memory_space<vmem>>, vector<8x32xf32>
      tpu.vector_store %arg15[%c0_49, %c0_50], %61 {strides = array<i32>} : memref<8x32xf32, #tpu.memory_space<vmem>>, vector<8x32xf32>,
    } else {
    }
    %c2_i32_26 = arith.constant 2 : i32
    %33 = arith.cmpi eq, %arg0, %c2_i32_26 : i32
    %34 = arith.extui %33 : i1 to i32
    %c0_i32_27 = arith.constant 0 : i32
    %35 = arith.cmpi ne, %34, %c0_i32_27 : i32
    scf.if %35 {
      %c0_28 = arith.constant 0 : index
      %c0_29 = arith.constant 0 : index
      %36 = vector.load %arg15[%c0_28, %c0_29] : memref<8x32xf32, #tpu.memory_space<vmem>>, vector<8x32xf32>
      %c0_30 = arith.constant 0 : index
      %c0_31 = arith.constant 0 : index
      %37 = vector.load %arg14[%c0_30, %c0_31] : memref<8x32xf32, #tpu.memory_space<vmem>>, vector<8x32xf32>
      tpu.vector_store %arg14[%c0_30, %c0_31], %36 {strides = array<i32>} : memref<8x32xf32, #tpu.memory_space<vmem>>, vector<8x32xf32>,
    } else {
    }
    return
  }
  func.func @transform_0(%arg0: i32) -> (i32, i32) {
    %c0_i32 = arith.constant 0 : i32
    %c0_i32_0 = arith.constant 0 : i32
    %c0_i32_1 = arith.constant 0 : i32
    return %c0_i32, %c0_i32_0 : i32, i32
  }
  func.func @transform_1(%arg0: i32) -> (i32, i32) {
    %c0_i32 = arith.constant 0 : i32
    %c0_i32_0 = arith.constant 0 : i32
    %c0_i32_1 = arith.constant 0 : i32
    return %c0_i32, %c0_i32_0 : i32, i32
  }
  func.func @transform_2(%arg0: i32) -> (i32, i32) {
    %c0_i32 = arith.constant 0 : i32
    %c0_i32_0 = arith.constant 0 : i32
    %c0_i32_1 = arith.constant 0 : i32
    return %c0_i32, %c0_i32_0 : i32, i32
  }
  func.func @transform_3(%arg0: i32) -> (i32, i32, i32) {
    %c0_i32 = arith.constant 0 : i32
    %c0_i32_0 = arith.constant 0 : i32
    %c0_i32_1 = arith.constant 0 : i32
    return %arg0, %c0_i32, %c0_i32_0 : i32, i32, i32
  }
  func.func @transform_4(%arg0: i32) -> (i32, i32, i32) {
    %c0_i32 = arith.constant 0 : i32
    %c0_i32_0 = arith.constant 0 : i32
    %c0_i32_1 = arith.constant 0 : i32
    return %arg0, %c0_i32, %c0_i32_0 : i32, i32, i32
  }
  func.func @transform_5(%arg0: i32) -> (i32, i32, i32) {
    %c0_i32 = arith.constant 0 : i32
    %c0_i32_0 = arith.constant 0 : i32
    %c0_i32_1 = arith.constant 0 : i32
    return %arg0, %c0_i32, %c0_i32_0 : i32, i32, i32
  }
  func.func @transform_6(%arg0: i32) -> (i32, i32, i32) {
    %c0_i32 = arith.constant 0 : i32
    %c0_i32_0 = arith.constant 0 : i32
    %c0_i32_1 = arith.constant 0 : i32
    return %arg0, %c0_i32, %c0_i32_0 : i32, i32, i32
  }
  func.func @transform_7(%arg0: i32) -> (i32, i32, i32) {
    %c0_i32 = arith.constant 0 : i32
    %c0_i32_0 = arith.constant 0 : i32
    %c0_i32_1 = arith.constant 0 : i32
    return %arg0, %c0_i32, %c0_i32_0 : i32, i32, i32
  }
  func.func @transform_8(%arg0: i32) -> (i32, i32, i32) {
    %c0_i32 = arith.constant 0 : i32
    %c0_i32_0 = arith.constant 0 : i32
    %c0_i32_1 = arith.constant 0 : i32
    return %arg0, %c0_i32, %c0_i32_0 : i32, i32, i32
  }
  func.func @transform_9(%arg0: i32) -> (i32, i32, i32) {
    %c0_i32 = arith.constant 0 : i32
    %c0_i32_0 = arith.constant 0 : i32
    %c0_i32_1 = arith.constant 0 : i32
    return %arg0, %c0_i32, %c0_i32_0 : i32, i32, i32
  }
  func.func @transform_10(%arg0: i32) -> (i32, i32, i32) {
    %c0_i32 = arith.constant 0 : i32
    %c0_i32_0 = arith.constant 0 : i32
    %c0_i32_1 = arith.constant 0 : i32
    return %arg0, %c0_i32, %c0_i32_0 : i32, i32, i32
  }
  func.func @transform_11(%arg0: i32) -> (i32, i32, i32) {
    %c0_i32 = arith.constant 0 : i32
    %c0_i32_0 = arith.constant 0 : i32
    %c0_i32_1 = arith.constant 0 : i32
    return %arg0, %c0_i32, %c0_i32_0 : i32, i32, i32
  }
  func.func @transform_12(%arg0: i32) -> (i32, i32, i32) {
    %c0_i32 = arith.constant 0 : i32
    %c0_i32_0 = arith.constant 0 : i32
    %c0_i32_1 = arith.constant 0 : i32
    return %arg0, %c0_i32, %c0_i32_0 : i32, i32, i32
  }
  func.func @transform_13(%arg0: i32) -> (i32, i32) {
    %c0_i32 = arith.constant 0 : i32
    %c0_i32_0 = arith.constant 0 : i32
    %c0_i32_1 = arith.constant 0 : i32
    return %c0_i32, %c0_i32_0 : i32, i32
  }
}

</mosaic_0001>

<bundles_post_ra>
// kernel: mpn_forward.1
= control target key start
LH: loop header
LB: loop body
LE: loop exit
PB: predicated region body
PF: predicated region fallthrough
CT: control target
= control target key end

     0   :  { %s2199_s0 = inlined_call_operand.vmem [shape: f32[8,32], index: 0, kind: input, shape index: {}]   ;;  %s2200_s1 = inlined_call_operand.vmem [shape: f32[16,128], index: 1, kind: input, shape index: {}]   ;;  %s2201_s2 = inlined_call_operand.vmem [shape: f32[32,8], index: 2, kind: input, shape index: {}]   ;;  %s2202_s3 = inlined_call_operand.vmem [shape: f32[3,32,160], index: 3, kind: input, shape index: {}]   ;;  %s2203_s4 = inlined_call_operand.vmem [shape: f32[3,32,128], index: 4, kind: input, shape index: {}]   ;;  %s2204_s5 = inlined_call_operand.vmem [shape: f32[3,128,128], index: 5, kind: input, shape index: {}]   ;;  %s2205_s6 = inlined_call_operand.vmem [shape: f32[3,1,128], index: 6, kind: input, shape index: {}]   ;;  %s2206_s7 = inlined_call_operand.vmem [shape: f32[3,128,32], index: 7, kind: input, shape index: {}]   ;;  %s2207_s8 = inlined_call_operand.vmem [shape: f32[3,1,32], index: 8, kind: input, shape index: {}]   ;;  %s2208_s9 = inlined_call_operand.vmem [shape: f32[3,32,32], index: 9, kind: input, shape index: {}]   ;;  %s2209_s10 = inlined_call_operand.vmem [shape: f32[3,32,32], index: 10, kind: input, shape index: {}]   ;;  %s2210_s11 = inlined_call_operand.vmem [shape: f32[3,1,32], index: 11, kind: input, shape index: {}]   ;;  %s2211_s12 = inlined_call_operand.vmem [shape: f32[3,16,128], index: 12, kind: output, shape index: {0}]   ;;  %s2212_s13 = inlined_call_operand.hbm [shape: f32[8,32], index: 13, kind: output, shape index: {1}]  }
   0x1   :  { %2216 = sst [smem:[#allocation7_spill]] %s2200_s1 }
   0x2   :  { %2217 = sst [smem:[#allocation8_spill]] %s2202_s3 }
   0x3   :  { %2218 = sst [smem:[#allocation9_spill]] %s2203_s4 }
   0x4   :  { %2219 = sst [smem:[#allocation10_spill]] %s2204_s5 }
   0x5   :  { %2220 = sst [smem:[#allocation11_spill]] %s2212_s13 }
   0x6   :  { %19 = vsyncpa [#allocation4], 0  ;;  %s1981_s25 = smov 0  }
   0x7 LB: > { %2221 = sst [smem:[#allocation6_spill]] %s1904_s25  ;;  %s1987_s26 = sadd.s32 4294967295, %s1904_s25   ;;  %s1904_s25 = sphi %s1981_s25, %s25_s25  }
   0x8   : > { %p1533_p0 = scmp.ge.s32.totalorder %s1904_s25, 1  ;;  %p460_p1 = scmp.lt.s32.totalorder %s1904_s25, 4 }
   0xa   : > { %p461_p2 = pnand %p1533_p0, %p460_p1 }
   0xb   : > { %p538_p3 = scmp.lt.s32.totalorder (!%p461_p2), %s1987_s26, 2  ;;  %s2222_s3 = sld [smem:[#allocation8_spill]] (!%p461_p2) }
   0xc   : > { %464 = sbr.rel (%p461_p2) target bundleno = 1183 (0x49f), region = 68  ;;  %s2223_s4 = sld [smem:[#allocation9_spill]] (!%p461_p2) }
   0xd   : > { %s2224_s5 = sld [smem:[#allocation10_spill]] (!%p461_p2)  ;;  %p1548_p4 = scmp.ne.s32.totalorder (!%p461_p2), %s1987_s26, 0 }
  0x13   : > { %s1993_s27 = scalar_select %p538_p3, %s1987_s26, 2 }
  0x14   : > { %v586_v0 = vld [vmem:[%s2199_s0] sm:$0xff] (!%p1548_p4)  ;;  %vm587_vm0 = vcmask (!%p1548_p4), 261120  }
  0x15   : > { %s1569_s28 = sshll.u32 %s1993_s27, 6  ;;  %s1570_s29 = sshll.u32 %s1993_s27, 5  ;;  %588 = vst.msk [vmem:[#allocation2] sm:$0xff] (!%p1548_p4), %vm587_vm0, %v586_v0 }
  0x16   : > { %s2000_s15 = scalar_lea.vmem %s2222_s3, %s1569_s28  ;;  %s2005_s18 = scalar_lea.vmem %s2223_s4, %s1570_s29 }
  0x17   : > { %s1571_s19 = sshll.u32 %s1993_s27, 7  ;;  %s563_s16 = scalar_lea.vmem %s2207_s8, %s1993_s27 }
  0x18   : > { %s2015_s25 = scalar_lea.vmem %s2224_s5, %s1571_s19  ;;  %s2020_s28 = scalar_lea.vmem %s2206_s7, %s1571_s19 }
  0x19   : > { %s2029_s4 = scalar_lea.vmem %s2208_s9, %s1570_s29  ;;  %s2034_s23 = scalar_lea.vmem %s2209_s10, %s1570_s29 }
  0x1a   : > { %s576_s1 = scalar_lea.vmem %s2210_s11, %s1993_s27  ;;  %s1575_s13 = sshll.u32 %s1993_s27, 4 }
  0x1b   : > { %s2044_s30 = scalar_lea.vmem %s2211_s12, %s1575_s13  ;;  %585 = sbr.rel (%p1548_p4) target bundleno = 34 (0x22), region = 72 }
  0x22 PF: > { %v2050_v1 = vld [vmem:[#allocation2] sm:$0xff]  ;;  %vm596_vm1 = vcmask 64512   ;;  %v593_v3 = vld [vmem:[%s2201_s2 + $0x8] sm:$0xff]  ;;  %v2063_v4 = vld [vmem:[%s2201_s2 + $0x10] sm:$0xff]  ;;  %v1906_v41 = vmov 0.0   ;;  %s2225_s3 = sld [smem:[#allocation7_spill]]  ;;  %s2226_s22 = scalar_lea.vmem %s2205_s6, %s1993_s27 }
  0x23   : > { %v592_v2 = vld [vmem:[%s2201_s2] sm:$0xff]  ;;  %1636 = vmatprep.subr.mxu0 %v2050_v1  ;;  %v874_v6 = vld [vmem:[%s2015_s25 + $0x8] sm:$0xff]  ;;  %v875_v7 = vld [vmem:[%s2015_s25 + $0x10] sm:$0xff]  ;;  %vm702_vm2 = vcmask 261120   ;;  %p1558_p5 = scmp.ge.s32.totalorder %s1987_s26, 2 }
  0x24   : > { %1638 = vmatprep.mubr.msk.f32.mxu0 %vm596_vm1, %v592_v2  ;;  %v873_v5 = vld [vmem:[%s2015_s25] sm:$0xff]  ;;  %1637 = vmatpush3.msra.mxu0 %v2050_v1  ;;  %v876_v8 = vld [vmem:[%s2015_s25 + $0x18] sm:$0xff]  ;;  %v878_v13 = vld [vmem:[%s2015_s25 + $0x28] sm:$0xff]  ;;  %vm1908_vm3 = vmmov (!%p1558_p5), 0   ;;  %vm1119_vm4 = vcmask (!%p1558_p5), 130048  }
  0x25   : > { %1639 = vmatmul.mubr.msk.f32.vlgmr.msra.gmra.mrb[0].mxu0 %vm596_vm1, %v593_v3  ;;  %v2074_v9 = vld [vmem:[%s2201_s2 + $0x18] sm:$0xff]  ;;  %v1770_v10 = vpack.c.bf16 %v874_v6, %v873_v5  ;;  %v1774_v11 = vpack.c.bf16 %v876_v8, %v875_v7  ;;  %v877_v12 = vld [vmem:[%s2015_s25 + $0x20] sm:$0xff]  ;;  %v695_v14 = vld [vmem:[%s2000_s15 + $0x8] sm:$0xff]  ;;  %1087 = vxpose.xlu0.b32.start [1/2] (short) (narrow) (!%p1558_p5), %v2063_v4, 8 }
  0x26   : > { %1641 = vmatprep.mubr.msk.f32.mxu0 %vm596_vm1, %v2063_v4  ;;  %v697_v15 = vld [vmem:[%s2000_s15 + $0x18] sm:$0xff]  ;;  %v694_v17 = vld [vmem:[%s2000_s15] sm:$0xff]  ;;  %v696_v18 = vld [vmem:[%s2000_s15 + $0x10] sm:$0xff]  ;;  %v1778_v22 = vpack.c.bf16 %v878_v13, %v877_v12 }
  0x27   : > { %1771 = vmatprep.subr.bf16.mxu1 %v1770_v10  ;;  %v1754_v16 = vpack.c.bf16 %v697_v15, %v695_v14  ;;  %v1756_v19 = vpack.c.bf16 %v696_v18, %v694_v17  ;;  %v699_v20 = vld [vmem:[%s2000_s15 + $0x28] sm:$0xff]  ;;  %v701_v21 = vld [vmem:[%s2000_s15 + $0x38] sm:$0xff]  ;;  %v698_v24 = vld [vmem:[%s2000_s15 + $0x20] sm:$0xff] }
  0x28   : > { %1773 = vmatpush3.bf16.msra.mxu1 %v1770_v10  ;;  %v1758_v23 = vpack.c.bf16 %v701_v21, %v699_v20  ;;  %v700_v25 = vld [vmem:[%s2000_s15 + $0x30] sm:$0xff]  ;;  %v880_v27 = vld [vmem:[%s2015_s25 + $0x38] sm:$0xff]  ;;  %v881_v30 = vld [vmem:[%s2015_s25 + $0x40] sm:$0xff] }
  0x29   : > { %1642 = vmatmul.mubr.msk.f32.gmra.mrb[2].mxu0 %vm596_vm1, %v2074_v9  ;;  %1775 = vmatprep.subr.bf16.mxu1 %v1774_v11  ;;  %v879_v26 = vld [vmem:[%s2015_s25 + $0x30] sm:$0xff]  ;;  %v1760_v28 = vpack.c.bf16 %v700_v25, %v698_v24  ;;  %v882_v31 = vld [vmem:[%s2015_s25 + $0x48] sm:$0xff]  ;;  %v884_v34 = vld [vmem:[%s2015_s25 + $0x58] sm:$0xff] }
  0x2a   : > { %1755 = vmatprep.subr.bf16.mxu0 %v1754_v16  ;;  %v1782_v29 = vpack.c.bf16 %v880_v27, %v879_v26  ;;  %v1786_v32 = vpack.c.bf16 %v882_v31, %v881_v30  ;;  %v883_v33 = vld [vmem:[%s2015_s25 + $0x50] sm:$0xff]  ;;  %v786_v36 = vld [vmem:[%s2005_s18] sm:$0xff]  ;;  %v787_v37 = vld [vmem:[%s2005_s18 + $0x8] sm:$0xff]  ;;  %773 = vmatprep.mubr.f32.mxu0 %v1906_v41 }
  0x2b   : > { %1757 = vmatpush1.bf16.msra.mxu0 %v1756_v19  ;;  %v1790_v35 = vpack.c.bf16 %v884_v34, %v883_v33  ;;  %v1762_v38 = vpack.c.bf16 %v787_v37, %v786_v36  ;;  %v885_v39 = vld [vmem:[%s2015_s25 + $0x60] sm:$0xff]  ;;  %v886_v40 = vld [vmem:[%s2015_s25 + $0x68] sm:$0xff]  ;;  %v887_v43 = vld [vmem:[%s2015_s25 + $0x70] sm:$0xff]  ;;  %1088 = vxpose.xlu0.b32.end [2/2] (short) (narrow) (!%p1558_p5), %v2074_v9, 8  ;;  %v1907_v33 = vmov (!%p1558_p5), 0.0|0.0   ;;  %v1909_v34 = vmov (!%p1558_p5), 0.0  }
  0x2c   : > { %1777 = vmatpush3.bf16.msra.mxu1 %v1774_v11  ;;  %1759 = vmatprep.subr.bf16.mxu0 %v1758_v23  ;;  %v1794_v42 = vpack.c.bf16 %v886_v40, %v885_v39  ;;  %v888_v44 = vld [vmem:[%s2015_s25 + $0x78] sm:$0xff]  ;;  %v590_v46 = vld [vmem:[%s2225_s3] sm:$0xff]  ;;  %v591_v47 = vld [vmem:[%s2225_s3 + $0x8] sm:$0xff] }
  0x2d   : > { %1779 = vmatprep.subr.bf16.mxu1 %v1778_v22  ;;  %v1798_v45 = vpack.c.bf16 %v888_v44, %v887_v43  ;;  %1687 = vmatprep.mubr.f32.mxu1 %v590_v46  ;;  %v788_v48 = vld [vmem:[%s2005_s18 + $0x10] sm:$0xff]  ;;  %v789_v49 = vld [vmem:[%s2005_s18 + $0x18] sm:$0xff]  ;;  %v1557_v2 = vld [vmem:[%s2226_s22] ss:$0 sm:$0xff] }
  0x2e   : > { %v1766_v51 = vpack.c.bf16 %v789_v49, %v788_v48  ;;  %v983_v11 = vld [vmem:[%s2020_s28] sm:$0xff] (!%p1558_p5)  ;;  %v984_v12 = vld [vmem:[%s2020_s28 + $0x8] sm:$0xff] (!%p1558_p5)  ;;  %v985_v13 = vld [vmem:[%s2020_s28 + $0x10] sm:$0xff] (!%p1558_p5) }
  0x2f   : > { %1761 = vmatpush1.bf16.msra.mxu0 %v1760_v28  ;;  %v1802_v14 = vpack.c.bf16 (!%p1558_p5), %v984_v12, %v983_v11  ;;  %v986_v15 = vld [vmem:[%s2020_s28 + $0x18] sm:$0xff] (!%p1558_p5)  ;;  %v987_v17 = vld [vmem:[%s2020_s28 + $0x20] sm:$0xff] (!%p1558_p5)  ;;  %v988_v18 = vld [vmem:[%s2020_s28 + $0x28] sm:$0xff] (!%p1558_p5) }
  0x30   : > { %1781 = vmatpush3.bf16.msra.mxu1 %v1778_v22  ;;  %1763 = vmatprep.subr.bf16.mxu0 %v1762_v38  ;;  %v1806_v16 = vpack.c.bf16 (!%p1558_p5), %v986_v15, %v985_v13  ;;  %v1810_v19 = vpack.c.bf16 (!%p1558_p5), %v988_v18, %v987_v17  ;;  %v989_v20 = vld [vmem:[%s2020_s28 + $0x30] sm:$0xff] (!%p1558_p5)  ;;  %v990_v21 = vld [vmem:[%s2020_s28 + $0x38] sm:$0xff] (!%p1558_p5)  ;;  %v991_v22 = vld [vmem:[%s2020_s28 + $0x40] sm:$0xff] (!%p1558_p5) }
  0x31   : > { %1783 = vmatprep.subr.bf16.mxu1 %v1782_v29  ;;  %v1814_v4 = vpack.c.bf16 (!%p1558_p5), %v990_v21, %v989_v20  ;;  %v992_v23 = vld [vmem:[%s2020_s28 + $0x48] sm:$0xff] (!%p1558_p5)  ;;  %v993_v25 = vld [vmem:[%s2020_s28 + $0x50] sm:$0xff] (!%p1558_p5)  ;;  %v994_v26 = vld [vmem:[%s2020_s28 + $0x58] sm:$0xff] (!%p1558_p5) }
  0x32   : > { %v1818_v24 = vpack.c.bf16 (!%p1558_p5), %v992_v23, %v991_v22  ;;  %v1822_v9 = vpack.c.bf16 (!%p1558_p5), %v994_v26, %v993_v25  ;;  %v995_v27 = vld [vmem:[%s2020_s28 + $0x60] sm:$0xff] (!%p1558_p5)  ;;  %v996_v28 = vld [vmem:[%s2020_s28 + $0x68] sm:$0xff] (!%p1558_p5)  ;;  %v997_v30 = vld [vmem:[%s2020_s28 + $0x70] sm:$0xff] (!%p1558_p5) }
  0x33   : > { %v998_v31 = vld [vmem:[%s2020_s28 + $0x78] sm:$0xff] (!%p1558_p5)  ;;  %v1559_v36 = vld [vmem:[%s563_s16] ss:$0 sm:$0xff] (!%p1558_p5)  ;;  %v1199_v49 = vld [vmem:[%s2034_s23 + $0x10] sm:$0xff] (!%p1558_p5) }
  0x34   : > { %1785 = vmatpush3.bf16.msra.mxu1 %v1782_v29  ;;  %v1826_v29 = vpack.c.bf16 (!%p1558_p5), %v996_v28, %v995_v27  ;;  %v1197_v44 = vld [vmem:[%s2034_s23] sm:$0xff] (!%p1558_p5) }
  0x35   : > { %1787 = vmatprep.subr.bf16.mxu1 %v1786_v32 }
  0x38   : > { %1789 = vmatpush3.bf16.msra.mxu1 %v1786_v32  ;;  %v1830_v32 = vpack.c.bf16 (!%p1558_p5), %v998_v31, %v997_v30 }
  0x39   : > { %1791 = vmatprep.subr.bf16.mxu1 %v1790_v35 }
  0x3c   : > { %1793 = vmatpush3.bf16.msra.mxu1 %v1790_v35 }
  0x3d   : > { %1795 = vmatprep.subr.bf16.mxu1 %v1794_v42 }
  0x40   : > { %1797 = vmatpush3.bf16.msra.mxu1 %v1794_v42 }
  0x41   : > { %1799 = vmatprep.subr.bf16.mxu1 %v1798_v45 }
  0x44   : > { %1801 = vmatpush3.bf16.msra.mxu1 %v1798_v45  ;;  %v1198_v45 = vld [vmem:[%s2034_s23 + $0x8] sm:$0xff] (!%p1558_p5) }
  0x45   : > { %1834 = vmatprep.subr.bf16.mxu1 (!%p1558_p5), %v1907_v33  ;;  %v1838_v48 = vpack.c.bf16 (!%p1558_p5), %v1198_v45, %v1197_v44 }
  0x47   : > { %1688 = vmatmul.mubr.f32.vlgmr.msra.gmra.mrb[0].mxu1 %v591_v47 }
  0x48   : > { %1729 = vmatprep.mubr.msk.f32.mxu1 (!%p1558_p5), %vm1908_vm3, %v1909_v34 }
  0xa7   : > { %v1103_v47 = vpop.trf.xlu0 (!%p1558_p5) }
  0xf8   : > { %v1640_v50 = vpop.f32.mrb[0].mxu0 }
  0xf9   : > { %v675_v52 = vpop.f32.mrb[1].mxu0 }
  0xfa   : > { %1553 = vmatmul.mubr.msk.f32.vlgmr.msra.gmra.mrb[4].mxu0 %vm702_vm2, %v675_v52  ;;  %v1193_v52 = vld [vmem:[%s2029_s4] sm:$0xff] (!%p1558_p5) }
  0xfb   : > { %1765 = vmatpush3.bf16.msra.mxu0 %v1762_v38  ;;  %779 = vmatprep.mubr.f32.mxu0 %v1906_v41 }
  0xfc   : > { %1767 = vmatprep.subr.bf16.mxu0 %v1766_v51  ;;  %v1643_v53 = vpop.f32.mrb[2].mxu0 }
  0xfd   : > { %v685_v54 = vpop.f32.mrb[3].mxu0 }
  0xfe   : > { %1554 = vmatmul.mubr.msk.f32.gmra.mrb[6].mxu0 %vm702_vm2, %v1640_v50  ;;  %v1200_v50 = vld [vmem:[%s2034_s23 + $0x18] sm:$0xff] (!%p1558_p5) }
  0xff   : > { %1769 = vmatpush3.bf16.msra.mxu0 %v1766_v51  ;;  %1652 = vmatprep.mubr.msk.f32.mxu0 %vm702_vm2, %v685_v54  ;;  %v1841_v51 = vpack.c.bf16 (!%p1558_p5), %v1200_v50, %v1199_v49 }
 0x100   : > { %1803 = vmatprep.subr.bf16.mxu0 (!%p1558_p5), %v1802_v14 }
 0x102   : > { %1653 = vmatmul.mubr.msk.f32.vlgmr.msra.gmra.mrb[8].mxu0 %vm702_vm2, %v1643_v53  ;;  %v1194_v53 = vld [vmem:[%s2029_s4 + $0x8] sm:$0xff] (!%p1558_p5) }
 0x103   : > { %1805 = vmatpush3.bf16.msra.mxu0 (!%p1558_p5), %v1802_v14  ;;  %v1844_v54 = vpack.c.bf16 (!%p1558_p5), %v1194_v53, %v1193_v52 }
 0x104   : > { %1807 = vmatprep.subr.bf16.mxu0 (!%p1558_p5), %v1806_v16 }
 0x107   : > { %1809 = vmatpush3.bf16.msra.mxu0 (!%p1558_p5), %v1806_v16 }
 0x108   : > { %1811 = vmatprep.subr.bf16.mxu0 (!%p1558_p5), %v1810_v19 }
 0x10b   : > { %1813 = vmatpush3.bf16.msra.mxu0 (!%p1558_p5), %v1810_v19 }
 0x10c   : > { %1815 = vmatprep.subr.bf16.mxu0 (!%p1558_p5), %v1814_v4 }
 0x10f   : > { %1817 = vmatpush3.bf16.msra.mxu0 (!%p1558_p5), %v1814_v4 }
 0x110   : > { %1819 = vmatprep.subr.bf16.mxu0 (!%p1558_p5), %v1818_v24 }
 0x113   : > { %1821 = vmatpush3.bf16.msra.mxu0 (!%p1558_p5), %v1818_v24 }
 0x114   : > { %1823 = vmatprep.subr.bf16.mxu0 (!%p1558_p5), %v1822_v9 }
 0x117   : > { %1825 = vmatpush3.bf16.msra.mxu0 (!%p1558_p5), %v1822_v9 }
 0x118   : > { %1827 = vmatprep.subr.bf16.mxu0 (!%p1558_p5), %v1826_v29 }
 0x11a   : > { %v1689_v55 = vpop.f32.mrb[0].mxu1 }
 0x11b   : > { %v955_v56 = vpop.f32.mrb[1].mxu1  ;;  %1829 = vmatpush3.bf16.msra.mxu0 (!%p1558_p5), %v1826_v29 }
 0x11c   : > { %1831 = vmatprep.subr.bf16.mxu0 (!%p1558_p5), %v1830_v32 }
 0x11f   : > { %1833 = vmatpush3.bf16.msra.mxu0 (!%p1558_p5), %v1830_v32 }
 0x1cd   : > { %v775_v57 = vpop.f32.mrb[4].mxu0 }
 0x1ce   : > { %v2114_v58 = vpop.f32.mrb[5].mxu0 }
 0x1d1   : > { %v781_v59 = vpop.f32.mrb[6].mxu0 }
 0x1d2   : > { %v2116_v60 = vpop.f32.mrb[7].mxu0 }
 0x1d5   : > { %v1654_v61 = vpop.f32.mrb[8].mxu0 }
 0x1d6   : > { %v872_v62 = vadd.f32 %v1654_v61, %v781_v59  ;;  %v862_v63 = vpop.f32.mrb[9].mxu0 }
 0x1d7   : > { %v871_v0 = vadd.f32 %v862_v63, %v775_v57  ;;  %v1563_v63 = vld [vmem:[%s576_s1] ss:$0 sm:$0xff] (!%p1558_p5) }
 0x1d8   : > { %v965_v3 = vadd.f32 %v1689_v55, %v872_v62  ;;  %v1195_v55 = vld [vmem:[%s2029_s4 + $0x10] sm:$0xff] (!%p1558_p5) }
 0x1d9   : > { %v964_v5 = vadd.f32 %v955_v56, %v871_v0  ;;  %982 = sbr.rel (%p1558_p5) target bundleno = 1143 (0x477), region = 76  ;;  %v1196_v56 = vld [vmem:[%s2029_s4 + $0x18] sm:$0xff] (!%p1558_p5) }
 0x1da   : > { %v974_v6 = vadd.f32 %v1557_v2, %v965_v3  ;;  %v1847_v59 = vpack.c.bf16 (!%p1558_p5), %v1196_v56, %v1195_v55 }
 0x1db   : > { %v973_v7 = vadd.f32 %v1557_v2, %v964_v5 }
 0x1dc   : > { %v976_v8 = vmax.f32 %v974_v6, 0.0 }
 0x1dd   : > { %v975_v10 = vmax.f32 %v973_v7, 0.0 }
 0x1de   : > { %978 = vst [vmem:[%s2044_s30 + $0x8] sm:$0xff] %v976_v8 }
 0x1df   : > { %977 = vst [vmem:[%s2044_s30] sm:$0xff] %v975_v10  ;;  %1722 = vmatprep.mubr.f32.mxu0 (!%p1558_p5), %v975_v10 }
 0x1e0   : > { %1723 = vmatmul.mubr.f32.vlgmr.msra.gmra.mrb[0].mxu0 %v976_v8 }
 0x2b3   : > { %v1724_v35 = vpop.f32.mrb[0].mxu0 }
 0x2b4   : > { %v1075_v37 = vadd.f32 %v1724_v35, %v2116_v60  ;;  %v1065_v38 = vpop.f32.mrb[1].mxu0 }
 0x2b5   : > { %v1074_v39 = vadd.f32 %v1065_v38, %v2114_v58 }
 0x2b6   : > { %v1084_v40 = vadd.f32 %v1559_v36, %v1075_v37 }
 0x2b7   : > { %v1083_v41 = vadd.f32 %v1559_v36, %v1074_v39 }
 0x2b8   : > { %v1086_v42 = vmax.f32 %v1084_v40, 0.0 }
 0x2b9   : > { %v1085_v43 = vmax.f32 %v1083_v41, 0.0 }
 0x2bb   : > { %v1835_v46 = vpack.c.bf16 %v1086_v42, %v1085_v43 }
 0x2bd   : > { %1836 = vmatpush3.bf16.msra.mxu1 %v1835_v46 }
 0x2be   : > { %1837 = vmatprep.subr.bf16.mxu1 %v1907_v33 }
 0x2c0   : > { %1730 = vmatmul.mubr.msk.f32.vlgmr.msra.gmra.mrb[0].mxu1 %vm1119_vm4, %v1103_v47 }
 0x2c1   : > { %1839 = vmatpush3.bf16.msra.mxu1 %v1838_v48  ;;  %1740 = vmatprep.mubr.msk.f32.mxu1 %vm1908_vm3, %v1909_v34 }
 0x2c2   : > { %1840 = vmatprep.subr.bf16.mxu1 %v1907_v33 }
 0x2c5   : > { %1842 = vmatpush3.bf16.msra.mxu1 %v1841_v51 }
 0x2c6   : > { %1843 = vmatprep.subr.bf16.mxu1 %v1907_v33 }
 0x393   : > { %v1189_v57 = vpop.f32.mrb[0].mxu1 }
 0x394   : > { %v1731_v58 = vpop.f32.mrb[1].mxu1  ;;  %1741 = vmatmul.mubr.msk.f32.vlgmr.msra.gmra.mrb[2].mxu1 %vm702_vm2, %v1189_v57 }
 0x395   : > { %1845 = vmatpush3.bf16.msra.mxu1 %v1844_v54  ;;  %1751 = vmatprep.mubr.msk.f32.mxu1 %vm1908_vm3, %v1909_v34 }
 0x396   : > { %1846 = vmatprep.subr.bf16.mxu1 %v1907_v33 }
 0x399   : > { %1848 = vmatpush3.bf16.msra.mxu1 %v1847_v59 }
 0x39c   : > { %1752 = vmatmul.mubr.msk.f32.vlgmr.msra.gmra.mrb[4].mxu1 %vm702_vm2, %v2050_v1 }
 0x467   : > { %v1270_v60 = vpop.f32.mrb[2].mxu1 }
 0x468   : > { %v1742_v61 = vpop.f32.mrb[3].mxu1 }
 0x46f   : > { %v1343_v62 = vpop.f32.mrb[4].mxu1 }
 0x470   : > { %v1344_v0 = vadd.f32 %v1343_v62, %v1270_v60  ;;  %v1753_v2 = vpop.f32.mrb[5].mxu1 }
 0x472   : > { %v1354_v3 = vadd.f32 %v1563_v63, %v1344_v0 }
 0x474   : > { %v1355_v5 = vmax.f32 %v1354_v3, 0.0 }
 0x476   : > { %1356 = vst.msk [vmem:[#allocation2] sm:$0xff] %vm702_vm2, %v1355_v5 }
 0x477 PF: > { %p1564_p6 = scmp.ne.s32.totalorder %s1987_s26, 2 }
 0x479   : > { %1360 = sbr.rel (%p1564_p6) target bundleno = 1152 (0x480), region = 80 }
 0x47d   : > { %v1361_v6 = vld [vmem:[#allocation2] sm:$0xff] (!%p1564_p6) }
 0x47e   : > { %1362 = vst.msk [vmem:[#allocation3] sm:$0xff] (!%p1564_p6), %vm702_vm2, %v1361_v6 }
 0x480 PF: > { %p1853_p7 = scmp.eq.s32.totalorder %s1987_s26, 2  ;;  %s1910_s4 = smov [#allocation3]  }
 0x481   : > { %s1378_s27 = sshll.u32 %s1910_s4, 4  ;;  %s1379_s27 = int_to_ptr.vmem [resolvable:$true] %s1378_s27 }
 0x482   : > { %s1868_s23 = scalar_lea.vmem %s1379_s27, 128  ;;  %p1875_p11 = scmp.lt.s32.totalorder %s1379_s27, %s1379_s27 }
 0x483   : > { %p1869_p8 = scmp.ne.s32.totalorder %s1379_s27, %s1868_s23  ;;  %p1876_p12 = scmp.lt.s32.totalorder %s1868_s23, %s1868_s23 }
 0x485   : > { %p1870_p9 = pnand %p1869_p8, %p1853_p7  ;;  %p1877_p13 = por %p1876_p12, %p1875_p11 }
 0x487   : > { %p1871_p10 = pneg %p1870_p9 }
 0x489   : > { %p1878_p0 = pnand %p1877_p13, %p1871_p10 }
 0x48b   : > { %1881 = shalt.err (!%p1878_p0)
}
 0x48c   : > { %s2227_s20 = sld [smem:[#allocation11_spill]] }
 0x492   : > { %s1882_s21 = scalar_lea.hbm %s2227_s20, 128 }
 0x493   : > { %p1883_p1 = scmp.ne.s32.totalorder %s2227_s20, %s1882_s21  ;;  %p1888_p4 = scmp.lt.u32.totalorder %s1882_s21, %s2227_s20 }
 0x495   : > { %p1884_p2 = pnand %p1883_p1, %p1853_p7 }
 0x497   : > { %p1885_p3 = pneg %p1884_p2 }
 0x499   : > { %p1890_p5 = pnand %p1888_p4, %p1885_p3 }
 0x49b   : > { %1893 = shalt.err (!%p1890_p5)
}
 0x49c   : > { %1850 = dma.vmem_to_hbm [thread:$0]  (%p1853_p7), %s1379_s27, 128, %s2227_s20, [#allocation4]  }
 0x49d   : > { %1899 = dma.done.wait (%p1853_p7), [#allocation4], 128  }
 0x49e   : > { %1901 = vsyncadd (%p1853_p7), [#allocation4], 4294967168 }
 0x49f PF: > { %s2228_s25 = sld [smem:[#allocation6_spill]] }
 0x4a5   : > { %s25_s25 = sadd.s32 1, %s2228_s25  }
 0x4a6   : > { %p22_p6 = scmp.ge.s32.totalorder %s25_s25, 5  }
 0x4a8   :  { %24 = sbr.rel (!%p22_p6) target bundleno = 7 (0x7), region = 143 }
 0x4af   :  { %1399 = vsyncpa [#allocation4], 1 }
 0x4b0   :  { %1401 = vsyncpa [#allocation4 + $0x1], 1 }

</bundles_post_ra>
